<compile_context>
chip_gen: v5e
topology: v5e:2x2
jax: 0.10.0
libtpu: 0.0.40
codegen_flags: <defaults>
</compile_context>

<pallas_src>
import functools

import jax
import jax.numpy as jnp
import numpy as np
from jax.experimental import pallas as pl
from jax.experimental.pallas import tpu as pltpu


_BLOCK_BYTES = 4 * 1024 * 1024   # per-input VMEM block (double-buffered by Pallas)
_THRESHOLD = 100.0


def _round_up(x, m):
    return ((x + m - 1) // m) * m


def _l2_points_kernel(pred_ref, gt_ref, out_ref, *, n_valid, block_lanes, n_points):
    """pred_ref/gt_ref: (2, P, bB) VMEM tiles with B on lanes. out_ref: (1, 8, 128) partials."""
    i = pl.program_id(0)

    px = pred_ref[0].astype(jnp.float32)     # [P, bB]
    py = pred_ref[1].astype(jnp.float32)
    gx = gt_ref[0].astype(jnp.float32)
    gy = gt_ref[1].astype(jnp.float32)

    dx = px - gx
    dy = py - gy
    dist = jnp.sqrt(dx * dx + dy * dy)       # [P, bB] per-point L2 distance

    # Reduce over the point axis (sublanes) -> one value per batch row (lane).
    col_sum = jnp.sum(dist, axis=0, keepdims=True)             # [1, bB]

    # mean(dist over P) < 100   <=>   sum < 100 * P   (divide folded away).
    lane = jax.lax.broadcasted_iota(jnp.int32, (1, block_lanes), 1) + i * block_lanes
    valid = lane < n_valid                                      # mask lane padding / ragged tail
    keep = jnp.logical_and(col_sum < jnp.float32(_THRESHOLD * n_points), valid)

    psum = jnp.sum(jnp.where(keep, col_sum, jnp.float32(0.0)))
    pcnt = jnp.sum(keep.astype(jnp.float32)) * jnp.float32(n_points)

    # Per-block partial output tile: lane 0 = selected sum, lane 1 = selected count.
    out_lane = jax.lax.broadcasted_iota(jnp.int32, (1, 8, 128), 2)
    tile = jnp.where(out_lane == 0, psum,
                     jnp.where(out_lane == 1, pcnt, jnp.float32(0.0)))
    out_ref[...] = tile


def l2_points_loss(pred_xy, prev_xy, next_xy, *, block_lanes=None):
    """pred_xy: [B, M+1+N, 2], prev_xy: [B, M, 2], next_xy: [B, N, 2] -> dict of scalar losses."""
    B, P, _ = pred_xy.shape
    dtype = pred_xy.dtype
    itemsize = jnp.dtype(dtype).itemsize

    # --- Block sizing: B on lanes, block a multiple of 128, ~_BLOCK_BYTES of VMEM each. ---
    p_sublanes = _round_up(P, 8)                       # VMEM sublane padding of the P axis
    bytes_per_lane = 2 * p_sublanes * itemsize         # one (2, P, 1) lane column, padded
    cap = max(128, (_BLOCK_BYTES // bytes_per_lane) // 128 * 128)
    if block_lanes is None:
        bB = min(cap, _round_up(B, 128))
    else:
        assert block_lanes % 128 == 0, "block_lanes must be a multiple of 128"
        bB = block_lanes
    B_pad = _round_up(B, bB)
    n_blocks = B_pad // bB
    pad = B_pad - B

    # --- Lane-dense plane assembly (B on the last axis). ---
    pred_t = jnp.transpose(pred_xy, (2, 1, 0))                          # [2, P, B] (single transpose)
    zero_row = jnp.zeros((1, B), dtype=dtype)                           # explicit shape: safe if N == 0
    gt_x = jnp.concatenate([prev_xy[..., 0].T, zero_row, next_xy[..., 0].T], axis=0)   # [P, B]
    gt_y = jnp.concatenate([prev_xy[..., 1].T, zero_row, next_xy[..., 1].T], axis=0)   # [P, B]
    gt_t = jnp.stack([gt_x, gt_y], axis=0)                              # [2, P, B]
    if pad:
        # Fused into the same assembly fusions (pure data-movement chain); padded lanes
        # are excluded by the in-kernel lane mask so their zero contents never contribute.
        pred_t = jnp.pad(pred_t, ((0, 0), (0, 0), (0, pad)))
        gt_t = jnp.pad(gt_t, ((0, 0), (0, 0), (0, pad)))

    kernel = functools.partial(_l2_points_kernel, n_valid=B, block_lanes=bB, n_points=P)

    partials = pl.pallas_call(
        kernel,
        grid=(n_blocks,),
        in_specs=[
            # TODO(synk): on v5e, add pipeline_mode=pl.Buffered(3) if DMAs are still exposed.
            pl.BlockSpec((2, P, bB), lambda i: (0, 0, i)),
            pl.BlockSpec((2, P, bB), lambda i: (0, 0, i)),
        ],
        out_specs=pl.BlockSpec((1, 8, 128), lambda i: (i, 0, 0)),
        out_shape=jax.ShapeDtypeStruct((n_blocks, 8, 128), jnp.float32),
        compiler_params=pltpu.CompilerParams(
            dimension_semantics=("parallel",),      # per-block partials -> megacore-safe on v7x
            vmem_limit_bytes=32 * 1024 * 1024,      # leave headroom on v7x (64 MiB physical / TC)
        ),
    )(pred_t, gt_t)

    total_sum = jnp.sum(partials[:, 0, 0])
    total_cnt = jnp.sum(partials[:, 0, 1])
    # NaN if no row passes the threshold -- matches torch's mean of an empty tensor.
    loss = total_sum / total_cnt
    return {"loss_driving": loss, "loss": loss}


def _reference(pred_xy, prev_xy, next_xy):
    zeros = jnp.zeros_like(next_xy[:, :1, :])
    gt_xy = jnp.concatenate([prev_xy, zeros, next_xy], axis=1)
    diff = pred_xy - gt_xy
    dist = jnp.sqrt(jnp.sum(diff ** 2, axis=-1))               # [B, P]
    keep = jnp.mean(dist, axis=-1) < _THRESHOLD                # [B]
    sel_sum = jnp.sum(dist * keep[:, None].astype(dist.dtype))
    sel_cnt = jnp.sum(keep.astype(dist.dtype)) * dist.shape[-1]
    return sel_sum / sel_cnt


if __name__ == "__main__":
    key = jax.random.PRNGKey(0)

    # ---- Test 1: module-consistent small shapes (B=2, M=4, N=4 -> P=9), single block ----
    B, M, N = 2, 4, 4
    P = M + 1 + N
    k1, k2, k3 = jax.random.split(key, 3)
    prev_xy = jax.random.normal(k1, (B, M, 2), dtype=jnp.float32) * 5.0
    next_xy = jax.random.normal(k2, (B, N, 2), dtype=jnp.float32) * 5.0
    gt_xy = jnp.concatenate([prev_xy, jnp.zeros((B, 1, 2), jnp.float32), next_xy], axis=1)
    pred_xy = gt_xy + 0.1 * jax.random.normal(k3, (B, P, 2), dtype=jnp.float32)

    out = l2_points_loss(pred_xy, prev_xy, next_xy)
    loss = jax.block_until_ready(out["loss"])
    ref = jax.block_until_ready(_reference(pred_xy, prev_xy, next_xy))
    assert np.allclose(np.asarray(loss), np.asarray(ref), rtol=1e-4, atol=1e-6), (
        f"test1 mismatch: kernel={loss} ref={ref}")

    # ---- Test 2: multi-block grid (3 lane blocks), ragged last block, rejected rows ----
    B2, M2, N2 = 300, 6, 5
    P2 = M2 + 1 + N2
    k4, k5, k6 = jax.random.split(jax.random.PRNGKey(1), 3)
    prev2 = jax.random.normal(k4, (B2, M2, 2), dtype=jnp.float32) * 5.0
    next2 = jax.random.normal(k5, (B2, N2, 2), dtype=jnp.float32) * 5.0
    gt2 = jnp.concatenate([prev2, jnp.zeros((B2, 1, 2), jnp.float32), next2], axis=1)
    pred2 = gt2 + 0.1 * jax.random.normal(k6, (B2, P2, 2), dtype=jnp.float32)
    # Push rows over the 100.0 mean-distance threshold in the first and last block.
    pred2 = pred2.at[3].add(1000.0).at[257].add(1000.0)

    out2 = l2_points_loss(pred2, prev2, next2, block_lanes=128)   # 3-step grid, 44-lane tail
    loss2 = jax.block_until_ready(out2["loss"])
    ref2 = jax.block_until_ready(_reference(pred2, prev2, next2))
    assert np.allclose(np.asarray(loss2), np.asarray(ref2), rtol=1e-4, atol=1e-6), (
        f"test2 mismatch: kernel={loss2} ref={ref2}")

    print("KERNEL_OK")
</pallas_src>

<mosaic_0001>
module attributes {stable_mosaic.version = 11 : i64} {
  func.func @_l2_points_kernel(%arg0: i32, %arg1: memref<2x9x128xf32, #tpu.memory_space<vmem>>, %arg2: memref<2x9x128xf32, #tpu.memory_space<vmem>>, %arg3: memref<1x8x128xf32, #tpu.memory_space<vmem>>) attributes {dimension_semantics = [#tpu.dimension_semantics<parallel>], iteration_bounds = array<i64: 1>, scalar_prefetch = 0 : i64, scratch_operands = 0 : i64, tpu.core_type = #tpu.core_type<tc>, window_params = [{transform_indices = @transform_0, window_bounds = array<i64: 2, 9, 128>}, {transform_indices = @transform_1, window_bounds = array<i64: 2, 9, 128>}, {transform_indices = @transform_2, window_bounds = array<i64: 1, 8, 128>}]} {
    %c0 = arith.constant 0 : index
    %c0_0 = arith.constant 0 : index
    %c0_1 = arith.constant 0 : index
    %0 = vector.load %arg1[%c0, %c0_0, %c0_1] : memref<2x9x128xf32, #tpu.memory_space<vmem>>, vector<1x9x128xf32>
    %1 = vector.shape_cast %0 : vector<1x9x128xf32> to vector<9x128xf32>
    %c1 = arith.constant 1 : index
    %c0_2 = arith.constant 0 : index
    %c0_3 = arith.constant 0 : index
    %2 = vector.load %arg1[%c1, %c0_2, %c0_3] : memref<2x9x128xf32, #tpu.memory_space<vmem>>, vector<1x9x128xf32>
    %3 = vector.shape_cast %2 : vector<1x9x128xf32> to vector<9x128xf32>
    %c0_4 = arith.constant 0 : index
    %c0_5 = arith.constant 0 : index
    %c0_6 = arith.constant 0 : index
    %4 = vector.load %arg2[%c0_4, %c0_5, %c0_6] : memref<2x9x128xf32, #tpu.memory_space<vmem>>, vector<1x9x128xf32>
    %5 = vector.shape_cast %4 : vector<1x9x128xf32> to vector<9x128xf32>
    %c1_7 = arith.constant 1 : index
    %c0_8 = arith.constant 0 : index
    %c0_9 = arith.constant 0 : index
    %6 = vector.load %arg2[%c1_7, %c0_8, %c0_9] : memref<2x9x128xf32, #tpu.memory_space<vmem>>, vector<1x9x128xf32>
    %7 = vector.shape_cast %6 : vector<1x9x128xf32> to vector<9x128xf32>
    %8 = arith.subf %1, %5 : vector<9x128xf32>
    %9 = arith.subf %3, %7 : vector<9x128xf32>
    %10 = arith.mulf %8, %8 : vector<9x128xf32>
    %11 = arith.mulf %9, %9 : vector<9x128xf32>
    %12 = arith.addf %10, %11 : vector<9x128xf32>
    %13 = math.sqrt %12 : vector<9x128xf32>
    %cst = arith.constant dense<0.000000e+00> : vector<128xf32>
    %14 = vector.multi_reduction <add>, %13, %cst [0] : vector<9x128xf32> to vector<128xf32>
    %15 = vector.shape_cast %14 : vector<128xf32> to vector<1x128xf32>
    %16 = tpu.iota {dimensions = array<i32: 1>} : vector<1x128xi32>
    %c128_i32 = arith.constant 128 : i32
    %17 = arith.muli %arg0, %c128_i32 : i32
    %18 = vector.broadcast %17 : i32 to vector<1x128xi32>
    %19 = arith.addi %16, %18 : vector<1x128xi32>
    %c2_i32 = arith.constant 2 : i32
    %20 = vector.broadcast %c2_i32 : i32 to vector<1x128xi32>
    %21 = arith.cmpi slt, %19, %20 : vector<1x128xi32>
    %cst_10 = arith.constant 9.000000e+02 : f32
    %22 = vector.broadcast %cst_10 : f32 to vector<1x128xf32>
    %23 = arith.cmpf olt, %15, %22 : vector<1x128xf32>
    %24 = arith.andi %23, %21 : vector<1x128xi1>
    %cst_11 = arith.constant 0.000000e+00 : f32
    %25 = vector.broadcast %cst_11 : f32 to vector<1x128xf32>
    %26 = arith.select %24, %15, %25 : vector<1x128xi1>, vector<1x128xf32>
    %27 = vector.shape_cast %26 : vector<1x128xf32> to vector<1x1x128xf32>
    %cst_12 = arith.constant dense<0.000000e+00> : vector<1xf32>
    %28 = vector.multi_reduction <add>, %27, %cst_12 [1, 2] : vector<1x1x128xf32> to vector<1xf32>
    %29 = vector.shape_cast %28 : vector<1xf32> to vector<1x1x1xf32>
    %30 = vector.extract %29[0, 0, 0] : f32 from vector<1x1x1xf32>
    %31 = arith.extui %24 : vector<1x128xi1> to vector<1x128xi32>
    %32 = arith.sitofp %31 : vector<1x128xi32> to vector<1x128xf32>
    %33 = vector.shape_cast %32 : vector<1x128xf32> to vector<1x1x128xf32>
    %cst_13 = arith.constant dense<0.000000e+00> : vector<1xf32>
    %34 = vector.multi_reduction <add>, %33, %cst_13 [1, 2] : vector<1x1x128xf32> to vector<1xf32>
    %35 = vector.shape_cast %34 : vector<1xf32> to vector<1x1x1xf32>
    %36 = vector.extract %35[0, 0, 0] : f32 from vector<1x1x1xf32>
    %cst_14 = arith.constant 9.000000e+00 : f32
    %37 = arith.mulf %36, %cst_14 : f32
    %38 = tpu.iota {dimensions = array<i32: 2>} : vector<1x8x128xi32>
    %c0_i32 = arith.constant 0 : i32
    %39 = vector.broadcast %c0_i32 : i32 to vector<1x8x128xi32>
    %40 = arith.cmpi eq, %38, %39 : vector<1x8x128xi32>
    %c1_i32 = arith.constant 1 : i32
    %41 = vector.broadcast %c1_i32 : i32 to vector<1x8x128xi32>
    %42 = arith.cmpi eq, %38, %41 : vector<1x8x128xi32>
    %cst_15 = arith.constant 0.000000e+00 : f32
    %43 = vector.broadcast %37 : f32 to vector<1x8x128xf32>
    %44 = vector.broadcast %cst_15 : f32 to vector<1x8x128xf32>
    %45 = arith.select %42, %43, %44 : vector<1x8x128xi1>, vector<1x8x128xf32>
    %46 = vector.broadcast %30 : f32 to vector<1x8x128xf32>
    %47 = arith.select %40, %46, %45 : vector<1x8x128xi1>, vector<1x8x128xf32>
    %c0_16 = arith.constant 0 : index
    %c0_17 = arith.constant 0 : index
    %c0_18 = arith.constant 0 : index
    %48 = vector.load %arg3[%c0_16, %c0_17, %c0_18] : memref<1x8x128xf32, #tpu.memory_space<vmem>>, vector<1x8x128xf32>
    tpu.vector_store %arg3[%c0_16, %c0_17, %c0_18], %47 {strides = array<i32>} : memref<1x8x128xf32, #tpu.memory_space<vmem>>, vector<1x8x128xf32>,
    return
  }
  func.func @transform_0(%arg0: i32) -> (i32, i32, i32) {
    %c0_i32 = arith.constant 0 : i32
    %c0_i32_0 = arith.constant 0 : i32
    %c0_i32_1 = arith.constant 0 : i32
    return %c0_i32, %c0_i32_0, %arg0 : i32, i32, i32
  }
  func.func @transform_1(%arg0: i32) -> (i32, i32, i32) {
    %c0_i32 = arith.constant 0 : i32
    %c0_i32_0 = arith.constant 0 : i32
    %c0_i32_1 = arith.constant 0 : i32
    return %c0_i32, %c0_i32_0, %arg0 : i32, i32, i32
  }
  func.func @transform_2(%arg0: i32) -> (i32, i32, i32) {
    %c0_i32 = arith.constant 0 : i32
    %c0_i32_0 = arith.constant 0 : i32
    %c0_i32_1 = arith.constant 0 : i32
    return %arg0, %c0_i32, %c0_i32_0 : i32, i32, i32
  }
}

</mosaic_0001>

<bundles_post_ra>
// kernel: tpu_custom_call.1
= control target key start
LH: loop header
LB: loop body
LE: loop exit
PB: predicated region body
PF: predicated region fallthrough
CT: control target
= control target key end

     0   :  { %s208_s0 = inlined_call_operand.vmem [shape: f32[2,9,128], index: 0, kind: input, shape index: {}]   ;;  %s209_s1 = inlined_call_operand.vmem [shape: f32[2,9,128], index: 1, kind: input, shape index: {}]   ;;  %s210_s2 = inlined_call_operand.hbm [shape: f32[1,8,128], index: 2, kind: output, shape index: {}]  }
   0x1   :  { %v12_v0 = vld [vmem:[%s208_s0] sm:$0xff]  ;;  %v13_v1 = vld [vmem:[%s208_s0 + $0x8] sm:$0x1]  ;;  %v120_v2 = vld [vmem:[%s208_s0 + $0x10] sm:$0xff] }
   0x2   :  { %v121_v3 = vld [vmem:[%s208_s0 + $0x18] sm:$0x1]  ;;  %v17_v4 = vld [vmem:[%s209_s1] sm:$0xff]  ;;  %v18_v5 = vld [vmem:[%s209_s1 + $0x8] sm:$0x1] }
   0x3   :  { %v122_v6 = vld [vmem:[%s209_s1 + $0x10] sm:$0xff]  ;;  %v123_v7 = vld [vmem:[%s209_s1 + $0x18] sm:$0x1]  ;;  %v22_v8 = vsub.f32 %v12_v0, %v17_v4  ;;  %v23_v9 = vsub.f32 %v13_v1, %v18_v5 }
   0x4   :  { %7 = vsyncpa [#allocation3], 0  ;;  %v24_v10 = vsub.f32 %v120_v2, %v122_v6  ;;  %v25_v11 = vsub.f32 %v121_v3, %v123_v7  ;;  %vm56_vm4 = vcmask 1040384   ;;  %v65_v42 = vlaneseq  ;;  %s162_s25 = smov [#allocation2]   ;;  %s111_s30 = sshll.u32 %s210_s2, 4  ;;  %s112_s30 = int_to_ptr.hbm [resolvable:$true] %s111_s30 }
   0x5   :  { %v26_v12 = vmul.f32 %v22_v8, %v22_v8  ;;  %v27_v13 = vmul.f32 %v23_v9, %v23_v9  ;;  %v161_v50 = vmov 0.0   ;;  %s109_s26 = sshll.u32 %s162_s25, 4  ;;  %s110_s26 = int_to_ptr.vmem [resolvable:$true] %s109_s26 }
   0x6   :  { %v28_v14 = vmul.f32 %v24_v10, %v24_v10  ;;  %v29_v15 = vmul.f32 %v25_v11, %v25_v11  ;;  %v66_v45 = vand.u32 127, %v65_v42 }
   0x8   :  { %v30_v16 = vadd.f32 %v28_v14, %v26_v12  ;;  %v31_v17 = vadd.f32 %v29_v15, %v27_v13  ;;  %vm70_vm5 = vcmp.lt.s32.totalorder %v66_v45, 2  ;;  %vm98_vm8 = vcmp.eq.s32.totalorder %v66_v45, 1 }
   0x9   :  { %vm97_vm9 = vcmp.eq.s32.totalorder %v66_v45, 0 }
   0xa   :  { %131 = vrsqrt.f32 %v30_v16  ;;  %vm39_vm0 = vcmp.eq.f32.partialorder %v30_v16, inf  ;;  %v42_v29 = vand.u32 2147483648, %v30_v16  ;;  %vm41_vm1 = vcmp.eq.f32.partialorder %v30_v16, 0.0 }
   0xb   :  { %133 = vrsqrt.f32 %v31_v17  ;;  %vm51_vm2 = vcmp.eq.f32.partialorder %v31_v17, inf  ;;  %v54_v32 = vand.u32 2147483648, %v31_v17  ;;  %vm53_vm3 = vcmp.eq.f32.partialorder %v31_v17, 0.0 }
  0x10   :  { %v132_v18 = vpop.eup %131 }
  0x11   :  { %v134_v19 = vpop.eup %133  ;;  %v33_v20 = vmul.f32 %v132_v18, %v30_v16 }
  0x12   :  { %v45_v21 = vmul.f32 %v134_v19, %v31_v17 }
  0x13   :  { %v34_v22 = vmul.f32 %v132_v18, %v33_v20 }
  0x14   :  { %v46_v23 = vmul.f32 %v134_v19, %v45_v21 }
  0x15   :  { %v35_v24 = vmul.f32 0.5, %v34_v22 }
  0x16   :  { %v47_v25 = vmul.f32 0.5, %v46_v23 }
  0x17   :  { %v36_v26 = vsub.f32 1.5, %v35_v24 }
  0x18   :  { %v48_v27 = vsub.f32 1.5, %v47_v25 }
  0x19   :  { %v37_v28 = vmul.f32 %v132_v18, %v36_v26 }
  0x1a   :  { %v49_v30 = vmul.f32 %v134_v19, %v48_v27 }
  0x1b   :  { %v38_v31 = vmul.f32 %v37_v28, %v30_v16 }
  0x1c   :  { %v50_v33 = vmul.f32 %v49_v30, %v31_v17 }
  0x1d   :  { %v40_v34 = vsel %vm39_vm0, %v30_v16, %v38_v31 }
  0x1e   :  { %v43_v35 = vsel %vm41_vm1, %v42_v29, %v40_v34  ;;  %v52_v36 = vsel %vm51_vm2, %v31_v17, %v50_v33 }
  0x1f   :  { %v55_v37 = vsel %vm53_vm3, %v54_v32, %v52_v36 }
  0x20   :  { %v57_v38 = vsel %vm56_vm4, %v55_v37, 0.0 }
  0x21   :  { %v58_v39 = vadd.f32 %v57_v38, %v43_v35 }
  0x23   :  { %v59_v40 = vrot.slane %v58_v39, 4 }
  0x25   :  { %v60_v41 = vadd.f32 %v59_v40, %v58_v39 }
  0x27   :  { %v61_v43 = vrot.slane %v60_v41, 2 }
  0x29   :  { %v62_v44 = vadd.f32 %v61_v43, %v60_v41 }
  0x2b   :  { %v63_v46 = vrot.slane %v62_v44, 1 }
  0x2d   :  { %v64_v47 = vadd.f32 %v63_v46, %v62_v44 }
  0x2f   :  { %vm71_vm6 = vcmp.lt.f32.partialorder %v64_v47, 900.0 }
  0x30   :  { %vm72_vm7 = vmand %vm71_vm6, %vm70_vm5 }
  0x31   :  { %v73_v48 = vsel %vm72_vm7, %v64_v47, 0.0  ;;  %v124_v51 = vsel %vm72_vm7, 1.0, %v161_v50 }
  0x32   :  { %v74_v49 = vsel %vm56_vm4, %v73_v48, 0.0  ;;  %v86_v52 = vsel %vm56_vm4, %v124_v51, 0.0 }
  0x33   :  { %75 = vadd.xlane.f32.xlu0 %v74_v49 }
  0x3b   :  { %87 = vadd.xlane.f32.xlu0 %v86_v52 }
  0xa6   :  { %v76_v53 = vpop.xlane.xlu0 %75 }
  0xa7   :  { %v77_v54 = vrot.slane %v76_v53, 4 }
  0xa9   :  { %v78_v55 = vadd.f32 %v77_v54, %v76_v53 }
  0xab   :  { %v79_v56 = vrot.slane %v78_v55, 2 }
  0xad   :  { %v80_v57 = vadd.f32 %v79_v56, %v78_v55 }
  0xae   :  { %v88_v58 = vpop.xlane.xlu0 %87 }
  0xaf   :  { %v89_v59 = vrot.slane %v88_v58, 4  ;;  %v81_v60 = vrot.slane %v80_v57, 1 }
  0xb1   :  { %v90_v61 = vadd.f32 %v89_v59, %v88_v58  ;;  %v82_v62 = vadd.f32 %v81_v60, %v80_v57 }
  0xb3   :  { %v91_v63 = vrot.slane %v90_v61, 2  ;;  %125 = vpush %v82_v62 }
  0xb5   :  { %v92_v0 = vadd.f32 %v91_v63, %v90_v61 }
  0xb7   :  { %v93_v1 = vrot.slane %v92_v0, 1 }
  0xb9   :  { %v94_v2 = vadd.f32 %v93_v1, %v92_v0 }
  0xbb   :  { %127 = vpush %v94_v2 }
  0xe4   :  { %s126_s0 = spop %125 }
  0xe5   :  { %v101_v4 = vstv %s126_s0 }
  0xec   :  { %s128_s1 = spop %127 }
  0xed   :  { %s96_s27 = smul.f32 9.0, %s128_s1 }
  0xef   :  { %v99_v3 = vstv %s96_s27 }
  0xf0   :  { %v100_v5 = vsel %vm98_vm8, %v99_v3, 0.0 }
  0xf1   :  { %v102_v6 = vsel %vm97_vm9, %v101_v4, %v100_v5 }
  0xf2   :  { %103 = vst [vmem:[#allocation2] sm:$0xff] %v102_v6 }
  0xf3   :  { %114 = dma.vmem_to_hbm [thread:$0]  %s110_s26, 128, %s112_s30, [#allocation3]  }
  0xf4   :  { %159 = dma.done.wait [#allocation3], 128  }
  0xf5   :  { %160 = vsyncadd [#allocation3], 4294967168 }
  0xf6   :  { %119 = vsyncpa [#allocation3], 1 }

</bundles_post_ra>
